<compile_context>
chip_gen: v7x
topology: tpu7x:2x2x1
jax: 0.10.0
libtpu: 0.0.40
codegen_flags: <defaults>
</compile_context>

<pallas_src>
import functools

import jax
import jax.numpy as jnp
from jax.experimental import pallas as pl
from jax.experimental.pallas import tpu as pltpu


LANE = 128
SUBLANE = 8


def _round_up(n, m):
    return ((n + m - 1) // m) * m


def _apply_output_nonlinearity(x, kind):
    if kind == "tanh":
        return jnp.tanh(x)
    if kind == "relu":
        return jnp.maximum(x, 0.0)
    if kind == "sigmoid":
        return jax.nn.sigmoid(x)
    if kind == "identity":
        return x
    raise ValueError(f"unknown nonlinearity: {kind}")


def _mlp_kernel_fused_bias(x_ref, w_ref, o_ref, *, in_features, in_pad, lane_width,
                           nonlinearity):
    # f32 path, bias folded into the packed weight operand.
    # x_ref : (TB, in_features)
    # w_ref : (L + in_pad + 8, L) f32
    #           rows [0:L]                    -> W2 (hidden->out), padded
    #           rows [L:L+in_features]        -> W1 (in->hidden),  padded
    #           row  [L+in_pad]               -> b1 (padded)
    #           row  [L+in_pad+1]             -> b2 (padded)
    # o_ref : (TB, L) f32  lane-dense; caller trims [:, :out_features]
    L = lane_width
    x = x_ref[...].astype(jnp.float32)          # mirrors torch `x.float()`
    w2 = w_ref[0:L, :]                          # sublane-aligned static slices
    w1 = w_ref[L:L + in_features, :]
    b1 = w_ref[L + in_pad:L + in_pad + 1, :]
    b2 = w_ref[L + in_pad + 1:L + in_pad + 2, :]

    h = jnp.dot(x, w1, preferred_element_type=jnp.float32)
    h = jnp.maximum(h + b1, 0.0)                # padded lanes stay exactly 0
    y = jnp.dot(h, w2, preferred_element_type=jnp.float32) + b2
    o_ref[...] = _apply_output_nonlinearity(y, nonlinearity)


def _mlp_kernel_split_bias(x_ref, w_ref, b_ref, o_ref, *, in_features, lane_width,
                           nonlinearity):
    # Low-precision (e.g. bf16) MXU path: weights in compute dtype, bias kept f32.
    L = lane_width
    cd = w_ref.dtype
    x = x_ref[...].astype(jnp.float32)
    w2 = w_ref[0:L, :]
    w1 = w_ref[L:L + in_features, :]

    h = jnp.dot(x.astype(cd), w1, preferred_element_type=jnp.float32)
    h = jnp.maximum(h + b_ref[0:1, :], 0.0)
    y = jnp.dot(h.astype(cd), w2, preferred_element_type=jnp.float32) + b_ref[1:2, :]
    o_ref[...] = _apply_output_nonlinearity(y, nonlinearity)


def prepare_mlp_params(w1, b1, w2, b2, *, compute_dtype=jnp.float32):
    """One-time packing of PyTorch-layout Linear params into kernel layout.

    w1: (hidden, in_features), b1: (hidden,)        -- fc1
    w2: (out_features, hidden), b2: (out_features,) -- fc2
    Returns (w_packed, b_packed_or_None, out_features).
      compute_dtype == f32  -> bias is folded into w_packed, b_packed is None.
      otherwise (e.g. bf16) -> bias returned separately in f32.
    """
    hidden, in_features = w1.shape
    out_features = w2.shape[0]
    L = _round_up(max(hidden, out_features), LANE)
    in_pad = _round_up(in_features, SUBLANE)

    # (in, hidden) / (hidden, out) layout, zero-padded to lane width L,
    # W1 rows padded to a sublane multiple so bias rows stay aligned.
    w1_p = jnp.zeros((in_pad, L), jnp.float32)
    w1_p = w1_p.at[:in_features, :hidden].set(jnp.asarray(w1, jnp.float32).T)
    w2_p = jnp.zeros((L, L), jnp.float32)
    w2_p = w2_p.at[:hidden, :out_features].set(jnp.asarray(w2, jnp.float32).T)

    b_rows = jnp.zeros((SUBLANE, L), jnp.float32)
    b_rows = b_rows.at[0, :hidden].set(jnp.asarray(b1, jnp.float32))
    b_rows = b_rows.at[1, :out_features].set(jnp.asarray(b2, jnp.float32))

    if compute_dtype == jnp.float32:
        # Fused bias: single packed operand [W2; W1; bias-rows].
        w_packed = jnp.concatenate([w2_p, w1_p, b_rows], axis=0)
        return w_packed, None, out_features

    w_packed = jnp.concatenate([w2_p, w1_p], axis=0).astype(compute_dtype)
    return w_packed, b_rows[:2], out_features


def _choose_batch_tile(B):
    """Pick a batch tile for the gridded path; None -> gridless (small B)."""
    for tb in (512, 256, 128):
        if B % tb == 0 and B // tb >= 2:
            return tb
    return None


@functools.partial(jax.jit, static_argnames=("out_features", "output_nonlinearity"))
def mlp_forward(x, w_packed, b_packed=None, *, out_features, output_nonlinearity="tanh"):
    """MLP forward pass: relu(x @ W1 + b1) @ W2 + b2 -> output nonlinearity."""
    B, in_features = x.shape
    L = w_packed.shape[1]
    in_pad = _round_up(in_features, SUBLANE)
    fused_bias = b_packed is None

    if fused_bias:
        kernel = functools.partial(
            _mlp_kernel_fused_bias, in_features=in_features, in_pad=in_pad,
            lane_width=L, nonlinearity=output_nonlinearity)
        operands = (x, w_packed)
    else:
        kernel = functools.partial(
            _mlp_kernel_split_bias, in_features=in_features,
            lane_width=L, nonlinearity=output_nonlinearity)
        operands = (x, w_packed, b_packed)

    # Advisory cost estimate so XLA can schedule/overlap this tiny call.
    flops = 2 * B * (in_features * L + L * L)
    transcendentals = B * L if output_nonlinearity in ("tanh", "sigmoid") else 0
    bytes_accessed = (x.size * x.dtype.itemsize
                      + w_packed.size * w_packed.dtype.itemsize
                      + (0 if fused_bias else b_packed.size * b_packed.dtype.itemsize)
                      + B * L * 4)
    cost = pl.CostEstimate(flops=flops, transcendentals=transcendentals,
                           bytes_accessed=bytes_accessed)

    tb = _choose_batch_tile(B)
    if tb is None:
        # Small B: gridless, everything VMEM-resident, single MXU pass per dot.
        vmem = pl.BlockSpec(memory_space=pltpu.MemorySpace.VMEM)
        y_pad = pl.pallas_call(
            kernel,
            out_shape=jax.ShapeDtypeStruct((B, L), jnp.float32),
            in_specs=[vmem] * len(operands),
            out_specs=vmem,
            cost_estimate=cost,
        )(*operands)
    else:
        # Large B: tile the batch axis, mark it parallel (shards across the
        # two TensorCores on v7x; harmless on v5e/v6e). Weights/bias use a
        # constant index_map so they stay VMEM-resident across grid steps.
        grid = (B // tb,)
        in_specs = [pl.BlockSpec((tb, in_features), lambda i: (i, 0)),
                    pl.BlockSpec(w_packed.shape, lambda i: (0, 0))]
        if not fused_bias:
            in_specs.append(pl.BlockSpec(b_packed.shape, lambda i: (0, 0)))
        y_pad = pl.pallas_call(
            kernel,
            out_shape=jax.ShapeDtypeStruct((B, L), jnp.float32),
            grid=grid,
            in_specs=in_specs,
            out_specs=pl.BlockSpec((tb, L), lambda i: (i, 0)),
            compiler_params=pltpu.CompilerParams(
                dimension_semantics=("parallel",)),
            cost_estimate=cost,
        )(*operands)

    # Lane-dense inside the kernel; trim zero-padded lanes here (jit-fused).
    return y_pad[:, :out_features]


def _reference(x, w1, b1, w2, b2, nonlinearity):
    h = jnp.maximum(jnp.asarray(x, jnp.float32) @ w1.T + b1, 0.0)
    y = h @ w2.T + b2
    return _apply_output_nonlinearity(y, nonlinearity)


if __name__ == "__main__":
    # Module hyperparameters (synthetic, deterministic init).
    in_features = 32
    hidden_layer_size = 64
    out_features = 16
    output_nonlinearity = "tanh"

    key = jax.random.PRNGKey(0)
    kx, kw1, kb1, kw2, kb2, kxl = jax.random.split(key, 6)

    # nn.Linear-style uniform init: U(-1/sqrt(fan_in), 1/sqrt(fan_in)).
    bound1 = 1.0 / (in_features ** 0.5)
    w1 = jax.random.uniform(kw1, (hidden_layer_size, in_features),
                            minval=-bound1, maxval=bound1, dtype=jnp.float32)
    b1 = jax.random.uniform(kb1, (hidden_layer_size,),
                            minval=-bound1, maxval=bound1, dtype=jnp.float32)
    bound2 = 1.0 / (hidden_layer_size ** 0.5)
    w2 = jax.random.uniform(kw2, (out_features, hidden_layer_size),
                            minval=-bound2, maxval=bound2, dtype=jnp.float32)
    b2 = jax.random.uniform(kb2, (out_features,),
                            minval=-bound2, maxval=bound2, dtype=jnp.float32)

    # --- default f32 path, small batch (gridless, fused-bias operand) ---
    batch = 8
    x = jax.random.normal(kx, (batch, in_features), dtype=jnp.float32)
    ref = _reference(x, w1, b1, w2, b2, output_nonlinearity)

    w_p, b_p, n_out = prepare_mlp_params(w1, b1, w2, b2, compute_dtype=jnp.float32)
    out = mlp_forward(x, w_p, out_features=n_out,
                      output_nonlinearity=output_nonlinearity)
    out = jax.block_until_ready(out)
    assert out.shape == (batch, out_features)
    assert jnp.allclose(out, ref, atol=1e-5, rtol=1e-5), "f32 gridless kernel mismatch"

    # --- f32 path, large batch (gridded, batch axis parallel) ---
    big_batch = 256
    x_big = jax.random.normal(kxl, (big_batch, in_features), dtype=jnp.float32)
    ref_big = _reference(x_big, w1, b1, w2, b2, output_nonlinearity)
    out_big = mlp_forward(x_big, w_p, out_features=n_out,
                          output_nonlinearity=output_nonlinearity)
    out_big = jax.block_until_ready(out_big)
    assert out_big.shape == (big_batch, out_features)
    assert jnp.allclose(out_big, ref_big, atol=1e-5, rtol=1e-5), "f32 gridded kernel mismatch"

    # --- optional bf16 MXU weight path (scaling-only option; looser tolerance) ---
    w_pb, b_pb, _ = prepare_mlp_params(w1, b1, w2, b2, compute_dtype=jnp.bfloat16)
    out_bf16 = mlp_forward(x, w_pb, b_pb, out_features=n_out,
                           output_nonlinearity=output_nonlinearity)
    out_bf16 = jax.block_until_ready(out_bf16)
    assert jnp.allclose(out_bf16, ref, atol=1e-1, rtol=1e-1), "bf16 kernel mismatch"

    print("KERNEL_OK")
</pallas_src>

<mosaic_0001>
module attributes {stable_mosaic.version = 11 : i64} {
  func.func @_mlp_kernel_fused_bias(%arg0: memref<8x32xf32, #tpu.memory_space<vmem>>, %arg1: memref<168x128xf32, #tpu.memory_space<vmem>>, %arg2: memref<8x128xf32, #tpu.memory_space<vmem>>) attributes {dimension_semantics = [], scalar_prefetch = 0 : i64, scratch_operands = 0 : i64, tpu.core_type = #tpu.core_type<tc>} {
    %c0 = arith.constant 0 : index
    %c0_0 = arith.constant 0 : index
    %0 = vector.load %arg0[%c0, %c0_0] : memref<8x32xf32, #tpu.memory_space<vmem>>, vector<8x32xf32>
    %c0_1 = arith.constant 0 : index
    %c0_2 = arith.constant 0 : index
    %1 = vector.load %arg1[%c0_1, %c0_2] : memref<168x128xf32, #tpu.memory_space<vmem>>, vector<128x128xf32>
    %c128 = arith.constant 128 : index
    %c0_3 = arith.constant 0 : index
    %2 = vector.load %arg1[%c128, %c0_3] : memref<168x128xf32, #tpu.memory_space<vmem>>, vector<32x128xf32>
    %c160 = arith.constant 160 : index
    %c0_4 = arith.constant 0 : index
    %3 = vector.load %arg1[%c160, %c0_4] : memref<168x128xf32, #tpu.memory_space<vmem>>, vector<1x128xf32>
    %c161 = arith.constant 161 : index
    %c0_5 = arith.constant 0 : index
    %4 = vector.load %arg1[%c161, %c0_5] : memref<168x128xf32, #tpu.memory_space<vmem>>, vector<1x128xf32>
    %cst = arith.constant dense<0.000000e+00> : vector<8x128xf32>
    %5 = tpu.matmul %0, %2, %cst {dimension_numbers = #tpu.dot_dimension_numbers<[1], [0], [0], [1], [0, 0, 1, 1], [], []>} : vector<8x32xf32>, vector<32x128xf32>, vector<8x128xf32> -> vector<8x128xf32>
    %6 = vector.broadcast %3 : vector<1x128xf32> to vector<8x128xf32>
    %7 = arith.addf %5, %6 : vector<8x128xf32>
    %cst_6 = arith.constant 0.000000e+00 : f32
    %8 = vector.broadcast %cst_6 : f32 to vector<8x128xf32>
    %9 = arith.maximumf %7, %8 : vector<8x128xf32>
    %cst_7 = arith.constant dense<0.000000e+00> : vector<8x128xf32>
    %10 = tpu.matmul %9, %1, %cst_7 {dimension_numbers = #tpu.dot_dimension_numbers<[1], [0], [0], [1], [0, 0, 1, 1], [], []>} : vector<8x128xf32>, vector<128x128xf32>, vector<8x128xf32> -> vector<8x128xf32>
    %11 = vector.broadcast %4 : vector<1x128xf32> to vector<8x128xf32>
    %12 = arith.addf %10, %11 : vector<8x128xf32>
    %13 = math.tanh %12 : vector<8x128xf32>
    %c0_8 = arith.constant 0 : index
    %c0_9 = arith.constant 0 : index
    %14 = vector.load %arg2[%c0_8, %c0_9] : memref<8x128xf32, #tpu.memory_space<vmem>>, vector<8x128xf32>
    tpu.vector_store %arg2[%c0_8, %c0_9], %13 {strides = array<i32>} : memref<8x128xf32, #tpu.memory_space<vmem>>, vector<8x128xf32>,
    return
  }
}

</mosaic_0001>

<bundles_post_ra>
// kernel: mlp_forward.1
= control target key start
LH: loop header
LB: loop body
LE: loop exit
PB: predicated region body
PF: predicated region fallthrough
CT: control target
= control target key end

     0   :  { %7 = vsyncpa [#allocation3], 0  ;;  %s481_s0 = inlined_call_operand.hbm [shape: f32[8,32], index: 0, kind: input, shape index: {}]   ;;  %s482_s1 = inlined_call_operand.hbm [shape: f32[168,128], index: 1, kind: input, shape index: {}]   ;;  %s483_s2 = inlined_call_operand.hbm [shape: f32[8,128], index: 2, kind: output, shape index: {}]  }
   0x1   :  { %8 = vsyncpa [#allocation6], 0 }
   0x2   :  { %9 = vsyncpa [#allocation4], 0  ;;  %s415_s9 = smov [#allocation2]   ;;  %s416_s11 = smov [#allocation5]  }
   0x3   :  { %s16_s10 = sshll.u32 %s415_s9, 4  ;;  %s25_s12 = sshll.u32 %s416_s11, 4  ;;  %s17_s10 = int_to_ptr.vmem [resolvable:$true] %s16_s10  ;;  %s438_s12 = int_to_ptr.vmem [resolvable:$true] %s25_s12 }
   0x4   :  { %s343_s15 = scalar_lea.hbm %s481_s0, 128 }
   0x5   :  { %p344_p0 = scmp.ne.s32.totalorder %s481_s0, %s343_s15  ;;  %p347_p1 = scmp.lt.u32.totalorder %s343_s15, %s481_s0 }
   0x7   :  { %p349_p2 = pnand %p347_p1, %p344_p0 }
   0x9   :  { %352 = shalt.err (!%p349_p2)
}
   0xa   :  { %s353_s20 = scalar_lea.vmem %s17_s10, 128  ;;  %p358_p4 = scmp.lt.s32.totalorder %s17_s10, %s17_s10 }
   0xb   :  { %p354_p3 = scmp.ne.s32.totalorder %s17_s10, %s353_s20  ;;  %p359_p5 = scmp.lt.s32.totalorder %s353_s20, %s353_s20 }
   0xd   :  { %p360_p6 = por %p359_p5, %p358_p4 }
   0xf   :  { %p361_p7 = pnand %p360_p6, %p354_p3 }
  0x11   :  { %364 = shalt.err (!%p361_p7)
}
  0x12   :  { %19 = dma.hbm_to_vmem [thread:$0]  %s481_s0, 128, %s17_s10, [#allocation3]  }
  0x13   :  { %s365_s25 = scalar_lea.hbm %s482_s1, 2688 }
  0x14   :  { %p366_p8 = scmp.ne.s32.totalorder %s482_s1, %s365_s25  ;;  %p369_p9 = scmp.lt.u32.totalorder %s365_s25, %s482_s1 }
  0x16   :  { %p371_p10 = pnand %p369_p9, %p366_p8 }
  0x18   :  { %374 = shalt.err (!%p371_p10)
}
  0x19   :  { %s375_s30 = scalar_lea.vmem %s438_s12, 2688  ;;  %p380_p12 = scmp.lt.s32.totalorder %s438_s12, %s438_s12 }
  0x1a   :  { %p376_p11 = scmp.ne.s32.totalorder %s438_s12, %s375_s30  ;;  %p381_p13 = scmp.lt.s32.totalorder %s375_s30, %s375_s30 }
  0x1c   :  { %p382_p0 = por %p381_p13, %p380_p12 }
  0x1e   :  { %p383_p1 = pnand %p382_p0, %p376_p11 }
  0x20   :  { %386 = shalt.err (!%p383_p1)
}
  0x21   :  { %s417_s0 = smov 128   ;;  %s418_s3 = smov 8  }
  0x22   :  { %31 = dma.hbm_to_vmem [thread:$0]  %s482_s1, 2688, %s438_s12, [#allocation6], %s417_s0, %s417_s0, %s418_s3  }
  0x23   :  { %409 = dma.done.wait [#allocation3], 128  }
  0x24   :  { %410 = vsyncadd [#allocation3], 4294967168 }
  0x25   :  { %411 = dma.done.wait [#allocation6], 2688  }
  0x26   :  { %412 = vsyncadd [#allocation6], 4294964608  ;;  %v419_v0 = vmov 0.0|0.0   ;;  %vm420_vm0 = vmmov 0   ;;  %v421_v1 = vmov 0.0   ;;  %v55_v2 = vld [vmem:[#allocation5 + $0x80] sm:$0xff] }
  0x27   :  { %303 = vmatprep.subr.bf16.mxu0 %v419_v0  ;;  %265 = vmatprep.mubr.msk.f32.mxu0 %vm420_vm0, %v421_v1  ;;  %v56_v3 = vld [vmem:[#allocation5 + $0x88] sm:$0xff]  ;;  %v57_v4 = vld [vmem:[#allocation5 + $0x90] sm:$0xff]  ;;  %v58_v6 = vld [vmem:[#allocation5 + $0x98] sm:$0xff]  ;;  %vm65_vm1 = vcmask 261120   ;;  %s422_s1 = smov [#allocation7]  }
  0x28   :  { %309 = vmatprep.subr.bf16.mxu1 %v419_v0  ;;  %300 = vmatprep.mubr.msk.f32.mxu1 %vm420_vm0, %v421_v1  ;;  %v304_v5 = vpack.c.bf16 %v56_v3, %v55_v2  ;;  %v39_v7 = vld [vmem:[#allocation5] sm:$0xff]  ;;  %v40_v8 = vld [vmem:[#allocation5 + $0x8] sm:$0xff]  ;;  %v41_v9 = vld [vmem:[#allocation5 + $0x10] sm:$0xff]  ;;  %v307_v11 = vpack.c.bf16 %v58_v6, %v57_v4  ;;  %s222_s6 = sshll.u32 %s422_s1, 4  ;;  %s223_s6 = int_to_ptr.vmem [resolvable:$true] %s222_s6 }
  0x29   :  { %v42_v10 = vld [vmem:[#allocation5 + $0x18] sm:$0xff]  ;;  %v310_v12 = vpack.c.bf16 %v40_v8, %v39_v7  ;;  %v43_v14 = vld [vmem:[#allocation5 + $0x20] sm:$0xff]  ;;  %v44_v15 = vld [vmem:[#allocation5 + $0x28] sm:$0xff]  ;;  %s387_s7 = scalar_lea.vmem %s223_s6, 128  ;;  %p392_p3 = scmp.lt.s32.totalorder %s223_s6, %s223_s6 }
  0x2a   :  { %305 = vmatpush3.bf16.msra.mxu0 %v304_v5  ;;  %v313_v13 = vpack.c.bf16 %v42_v10, %v41_v9  ;;  %v38_v16 = vld [vmem:[#allocation2] sm:$0xff]  ;;  %v316_v17 = vpack.c.bf16 %v44_v15, %v43_v14  ;;  %v45_v18 = vld [vmem:[#allocation5 + $0x30] sm:$0xff]  ;;  %v47_v21 = vld [vmem:[#allocation5 + $0x40] sm:$0xff]  ;;  %p388_p2 = scmp.ne.s32.totalorder %s223_s6, %s387_s7  ;;  %p393_p4 = scmp.lt.s32.totalorder %s387_s7, %s387_s7 }
  0x2b   :  { %306 = vmatprep.subr.bf16.mxu0 %v419_v0  ;;  %311 = vmatpush3.bf16.msra.mxu1 %v310_v12  ;;  %v46_v19 = vld [vmem:[#allocation5 + $0x38] sm:$0xff]  ;;  %v48_v22 = vld [vmem:[#allocation5 + $0x48] sm:$0xff]  ;;  %v49_v24 = vld [vmem:[#allocation5 + $0x50] sm:$0xff] }
  0x2c   :  { %312 = vmatprep.subr.bf16.mxu1 %v419_v0  ;;  %v319_v20 = vpack.c.bf16 %v46_v19, %v45_v18  ;;  %v322_v23 = vpack.c.bf16 %v48_v22, %v47_v21  ;;  %v50_v25 = vld [vmem:[#allocation5 + $0x58] sm:$0xff]  ;;  %v51_v27 = vld [vmem:[#allocation5 + $0x60] sm:$0xff]  ;;  %v52_v28 = vld [vmem:[#allocation5 + $0x68] sm:$0xff]  ;;  %p394_p5 = por %p393_p4, %p392_p3 }
  0x2d   :  { %v325_v26 = vpack.c.bf16 %v50_v25, %v49_v24  ;;  %v328_v29 = vpack.c.bf16 %v52_v28, %v51_v27  ;;  %v53_v30 = vld [vmem:[#allocation5 + $0x70] sm:$0xff]  ;;  %v54_v31 = vld [vmem:[#allocation5 + $0x78] sm:$0xff]  ;;  %v232_v33 = vld [vmem:[#allocation5 + $0xa0] ss:$0 sm:$0xff] }
  0x2e   :  { %308 = vmatpush3.bf16.msra.mxu0 %v307_v11  ;;  %v331_v32 = vpack.c.bf16 %v54_v31, %v53_v30  ;;  %v234_v38 = vld [vmem:[#allocation5 + $0xa1] ss:$0 sm:$0xff]  ;;  %p395_p6 = pnand %p394_p5, %p388_p2 }
  0x2f   :  { %314 = vmatpush3.bf16.msra.mxu1 %v313_v13 }
  0x30   :  { %315 = vmatprep.subr.bf16.mxu1 %v419_v0 }
  0x31   :  { %266 = vmatmul.mubr.msk.f32.vlgmr.msra.gmra.mrb[0].mxu0 %vm65_vm1, %v38_v16 }
  0x33   :  { %317 = vmatpush3.bf16.msra.mxu1 %v316_v17 }
  0x34   :  { %318 = vmatprep.subr.bf16.mxu1 %v419_v0 }
  0x37   :  { %320 = vmatpush3.bf16.msra.mxu1 %v319_v20 }
  0x38   :  { %321 = vmatprep.subr.bf16.mxu1 %v419_v0 }
  0x3b   :  { %323 = vmatpush3.bf16.msra.mxu1 %v322_v23 }
  0x3c   :  { %324 = vmatprep.subr.bf16.mxu1 %v419_v0 }
  0x3f   :  { %326 = vmatpush3.bf16.msra.mxu1 %v325_v26 }
  0x40   :  { %327 = vmatprep.subr.bf16.mxu1 %v419_v0 }
  0x43   :  { %329 = vmatpush3.bf16.msra.mxu1 %v328_v29 }
  0x44   :  { %330 = vmatprep.subr.bf16.mxu1 %v419_v0 }
  0x47   :  { %332 = vmatpush3.bf16.msra.mxu1 %v331_v32 }
 0x104   :  { %v135_v34 = vpop.f32.mrb[0].mxu0 }
 0x105   :  { %v136_v35 = vadd.f32 %v232_v33, %v135_v34  ;;  %v267_v36 = vpop.f32.mrb[1].mxu0 }
 0x107   :  { %v139_v37 = vmax.f32 %v136_v35, 0.0 }
 0x109   :  { %301 = vmatmul.mubr.f32.vlgmr.msra.gmra.mrb[0].mxu1 %v139_v37 }
 0x1dc   :  { %v210_v39 = vpop.f32.mrb[0].mxu1 }
 0x1dd   :  { %v211_v40 = vadd.f32 %v234_v38, %v210_v39  ;;  %v302_v41 = vpop.f32.mrb[1].mxu1 }
 0x1df   :  { %341 = vtanh.f32 %v211_v40 }
 0x1e9   :  { %v342_v42 = vpop.eup %341 }
 0x1ea   :  { %215 = vst [vmem:[#allocation7] sm:$0xff] %v342_v42 }
 0x1eb   :  { %398 = shalt.err (!%p395_p6)
}
 0x1ec   :  { %s399_s10 = scalar_lea.hbm %s483_s2, 128 }
 0x1ed   :  { %p400_p7 = scmp.ne.s32.totalorder %s483_s2, %s399_s10  ;;  %p403_p8 = scmp.lt.u32.totalorder %s399_s10, %s483_s2 }
 0x1ef   :  { %p405_p9 = pnand %p403_p8, %p400_p7 }
 0x1f1   :  { %408 = shalt.err (!%p405_p9)
}
 0x1f2   :  { %225 = dma.vmem_to_hbm [thread:$0]  %s223_s6, 128, %s483_s2, [#allocation4]  }
 0x1f3   :  { %413 = dma.done.wait [#allocation4], 128  }
 0x1f4   :  { %414 = vsyncadd [#allocation4], 4294967168 }
 0x1f5   :  { %229 = vsyncpa [#allocation3], 1 }
 0x1f6   :  { %230 = vsyncpa [#allocation6], 1 }
 0x1f7   :  { %231 = vsyncpa [#allocation4], 1 }

</bundles_post_ra>
